<compile_context>
chip_gen: v6e
topology: v6e:2x2x1
jax: 0.10.0
libtpu: 0.0.40
codegen_flags: <defaults>
</compile_context>

<pallas_src>
import jax
import jax.numpy as jnp
from jax.experimental import pallas as pl
from jax.experimental.pallas import tpu as pltpu

KH = KW = 2        # Conv2d kernel size
BN_EPS = 1e-5      # BatchNorm2d default eps


def conv_bn_kernel(s_ref, x_ref, o_ref):
    """Fused 2x2 conv (single in/out channel) + folded eval-mode batch norm.

    s_ref : SMEM (5,) f32  [w00, w01, w10, w11, bias']  (BN already folded in)
    x_ref : VMEM (Hp, Wp)  zero-padded input image (one image per grid step)
    o_ref : VMEM (Hp, Wp)  output; valid (H-1, W-1) window sliced by wrapper
    """
    x = x_ref[...]
    hp, wp = x.shape
    # roll(x, n-1, axis) == jnp.roll(x, -1, axis): element j+1 moves to slot j.
    # Wrapped values only land in the last row/col, which the wrapper slices off.
    x_r = pltpu.roll(x, shift=wp - 1, axis=1)       # x[i,   j+1]
    x_d = pltpu.roll(x, shift=hp - 1, axis=0)       # x[i+1, j  ]
    x_dr = pltpu.roll(x_r, shift=hp - 1, axis=0)    # x[i+1, j+1]

    acc = s_ref[0] * x + s_ref[1] * x_r             # init with first tap (no zeros tile)
    acc = acc + s_ref[2] * x_d + s_ref[3] * x_dr
    o_ref[...] = (acc + s_ref[4]).astype(o_ref.dtype)   # single full-tile store


def _round_up(x, m):
    return (x + m - 1) // m * m


def conv_bn_forward(x_nchw, conv_w, conv_b, bn_gamma, bn_beta, bn_mean, bn_var):
    """x_nchw: (N, 1, H, W) float32. Returns (N, 1, H-1, W-1) float32."""
    n, c, h, w = x_nchw.shape
    assert c == 1, "module is Conv2d(1, 1, 2): single channel"
    ho, wo = h - KH + 1, w - KW + 1
    hp = _round_up(h, 8)      # sublane-aligned
    wp = _round_up(w, 128)    # lane-dense output / aligned stores

    f32 = jnp.float32
    # Fold eval-mode BN into the conv weight / bias.
    scale = bn_gamma.astype(f32).reshape(()) * jax.lax.rsqrt(
        bn_var.astype(f32).reshape(()) + BN_EPS)
    w_fold = conv_w.astype(f32).reshape(KH * KW) * scale                    # (4,)
    b_fold = (conv_b.astype(f32).reshape(()) - bn_mean.astype(f32).reshape(())
              ) * scale + bn_beta.astype(f32).reshape(())
    scalars = jnp.concatenate([w_fold, b_fold.reshape(1)])                  # (5,)

    x3 = x_nchw.astype(f32).reshape(n, h, w)
    x3 = jnp.pad(x3, ((0, 0), (0, hp - h), (0, wp - w)))                    # zero halo/pad

    # TODO(synk): for images too large for a (Hp, Wp) tile in VMEM (v7x: 64 MiB
    # physical), add a second grid axis over H with a KH-1-row halo per tile.
    out = pl.pallas_call(
        conv_bn_kernel,
        grid=(n,),
        in_specs=[
            pl.BlockSpec(memory_space=pltpu.SMEM),                # folded scalars
            pl.BlockSpec((None, hp, wp), lambda i: (i, 0, 0)),    # one image / step
        ],
        out_specs=pl.BlockSpec((None, hp, wp), lambda i: (i, 0, 0)),
        out_shape=jax.ShapeDtypeStruct((n, hp, wp), f32),
        compiler_params=pltpu.CompilerParams(
            dimension_semantics=("parallel",),        # v7x: split batch over 2 TCs
            vmem_limit_bytes=32 * 1024 * 1024,        # safe on v5e/v6e/v7x
        ),
        cost_estimate=pl.CostEstimate(
            flops=9 * n * hp * wp,                    # 4 mul + 5 add per element
            transcendentals=0,
            bytes_accessed=(2 * n * hp * wp + 5) * 4,
        ),
    )(scalars, x3)

    return out[:, :ho, :wo].reshape(n, 1, ho, wo)


def _reference(x_nchw, conv_w, conv_b, bn_gamma, bn_beta, bn_mean, bn_var):
    """Pure-JAX reference (lax conv + eval batch norm) for a correctness check."""
    y = jax.lax.conv_general_dilated(
        x_nchw, conv_w, window_strides=(1, 1), padding="VALID",
        dimension_numbers=("NCHW", "OIHW", "NCHW"))
    y = y + conv_b.reshape(1, 1, 1, 1)
    return (y - bn_mean) * jax.lax.rsqrt(bn_var + BN_EPS) * bn_gamma + bn_beta


if __name__ == "__main__":
    key = jax.random.PRNGKey(0)
    kx, kw, kb = jax.random.split(key, 3)

    # Small shapes consistent with the module: N=2, C=1, H=W=8
    x = jax.random.normal(kx, (2, 1, 8, 8), dtype=jnp.float32)

    # Deterministic parameter init (Conv2d(1,1,2) shapes; BN defaults).
    fan_in = 1 * KH * KW
    bound = 1.0 / (fan_in ** 0.5)
    conv_w = jax.random.uniform(kw, (1, 1, KH, KW), jnp.float32, -bound, bound)
    conv_b = jax.random.uniform(kb, (1,), jnp.float32, -bound, bound)
    bn_gamma = jnp.ones((1,), jnp.float32)
    bn_beta = jnp.zeros((1,), jnp.float32)
    bn_mean = jnp.zeros((1,), jnp.float32)   # running_mean default
    bn_var = jnp.ones((1,), jnp.float32)     # running_var default

    out = conv_bn_forward(x, conv_w, conv_b, bn_gamma, bn_beta, bn_mean, bn_var)
    out = jax.block_until_ready(out)

    ref = _reference(x, conv_w, conv_b, bn_gamma, bn_beta, bn_mean, bn_var)
    assert out.shape == (2, 1, 7, 7)
    assert jnp.allclose(out, ref, atol=1e-5, rtol=1e-5)

    print("KERNEL_OK")
</pallas_src>

<mosaic_0001>
module attributes {stable_mosaic.version = 11 : i64} {
  func.func @conv_bn_kernel(%arg0: i32, %arg1: memref<5xf32, #tpu.memory_space<smem>>, %arg2: memref<1x8x128xf32, #tpu.memory_space<vmem>>, %arg3: memref<1x8x128xf32, #tpu.memory_space<vmem>>) attributes {dimension_semantics = [#tpu.dimension_semantics<parallel>], iteration_bounds = array<i64: 2>, scalar_prefetch = 0 : i64, scratch_operands = 0 : i64, tpu.core_type = #tpu.core_type<tc>, window_params = [{transform_indices = @transform_0, window_bounds = array<i64: 5>}, {transform_indices = @transform_1, window_bounds = array<i64: 1, 8, 128>}, {transform_indices = @transform_2, window_bounds = array<i64: 1, 8, 128>}]} {
    %c0 = arith.constant 0 : index
    %c0_0 = arith.constant 0 : index
    %c0_1 = arith.constant 0 : index
    %0 = vector.load %arg2[%c0, %c0_0, %c0_1] : memref<1x8x128xf32, #tpu.memory_space<vmem>>, vector<1x8x128xf32>
    %1 = vector.shape_cast %0 : vector<1x8x128xf32> to vector<8x128xf32>
    %c127_i32 = arith.constant 127 : i32
    %2 = tpu.dynamic_rotate %1 by %c127_i32 dim 1 : vector<8x128xf32>, i32 -> vector<8x128xf32>
    %c7_i32 = arith.constant 7 : i32
    %3 = tpu.dynamic_rotate %1 by %c7_i32 dim 0 : vector<8x128xf32>, i32 -> vector<8x128xf32>
    %c7_i32_2 = arith.constant 7 : i32
    %4 = tpu.dynamic_rotate %2 by %c7_i32_2 dim 0 : vector<8x128xf32>, i32 -> vector<8x128xf32>
    %c0_3 = arith.constant 0 : index
    %5 = memref.load %arg1[%c0_3] : memref<5xf32, #tpu.memory_space<smem>>
    %6 = vector.broadcast %5 : f32 to vector<8x128xf32>
    %7 = arith.mulf %6, %1 : vector<8x128xf32>
    %c1 = arith.constant 1 : index
    %8 = memref.load %arg1[%c1] : memref<5xf32, #tpu.memory_space<smem>>
    %9 = vector.broadcast %8 : f32 to vector<8x128xf32>
    %10 = arith.mulf %9, %2 : vector<8x128xf32>
    %11 = arith.addf %7, %10 : vector<8x128xf32>
    %c2 = arith.constant 2 : index
    %12 = memref.load %arg1[%c2] : memref<5xf32, #tpu.memory_space<smem>>
    %13 = vector.broadcast %12 : f32 to vector<8x128xf32>
    %14 = arith.mulf %13, %3 : vector<8x128xf32>
    %15 = arith.addf %11, %14 : vector<8x128xf32>
    %c3 = arith.constant 3 : index
    %16 = memref.load %arg1[%c3] : memref<5xf32, #tpu.memory_space<smem>>
    %17 = vector.broadcast %16 : f32 to vector<8x128xf32>
    %18 = arith.mulf %17, %4 : vector<8x128xf32>
    %19 = arith.addf %15, %18 : vector<8x128xf32>
    %c4 = arith.constant 4 : index
    %20 = memref.load %arg1[%c4] : memref<5xf32, #tpu.memory_space<smem>>
    %21 = vector.broadcast %20 : f32 to vector<8x128xf32>
    %22 = arith.addf %19, %21 : vector<8x128xf32>
    %c0_4 = arith.constant 0 : index
    %c0_5 = arith.constant 0 : index
    %c0_6 = arith.constant 0 : index
    %23 = vector.load %arg3[%c0_4, %c0_5, %c0_6] : memref<1x8x128xf32, #tpu.memory_space<vmem>>, vector<1x8x128xf32>
    %24 = vector.shape_cast %23 : vector<1x8x128xf32> to vector<8x128xf32>
    %25 = vector.shape_cast %22 : vector<8x128xf32> to vector<1x8x128xf32>
    tpu.vector_store %arg3[%c0_4, %c0_5, %c0_6], %25 {strides = array<i32>} : memref<1x8x128xf32, #tpu.memory_space<vmem>>, vector<1x8x128xf32>,
    return
  }
  func.func @transform_0(%arg0: i32) -> i32 {
    %c0_i32 = arith.constant 0 : i32
    %c0_i32_0 = arith.constant 0 : i32
    return %c0_i32 : i32
  }
  func.func @transform_1(%arg0: i32) -> (i32, i32, i32) {
    %c0_i32 = arith.constant 0 : i32
    %c0_i32_0 = arith.constant 0 : i32
    %c0_i32_1 = arith.constant 0 : i32
    return %arg0, %c0_i32, %c0_i32_0 : i32, i32, i32
  }
  func.func @transform_2(%arg0: i32) -> (i32, i32, i32) {
    %c0_i32 = arith.constant 0 : i32
    %c0_i32_0 = arith.constant 0 : i32
    %c0_i32_1 = arith.constant 0 : i32
    return %arg0, %c0_i32, %c0_i32_0 : i32, i32, i32
  }
}

</mosaic_0001>

<bundles_post_ra>
// kernel: tpu_custom_call.1
= control target key start
LH: loop header
LB: loop body
LE: loop exit
PB: predicated region body
PF: predicated region fallthrough
CT: control target
= control target key end

     0   :  { %7 = vsyncpa [#allocation5], 0  ;;  %s641_s0 = inlined_call_operand.hbm [shape: f32[5], index: 0, kind: input, shape index: {}]   ;;  %s642_s1 = inlined_call_operand.hbm [shape: f32[2,8,128], index: 1, kind: input, shape index: {}]   ;;  %s643_s2 = inlined_call_operand.hbm [shape: f32[2,8,128], index: 2, kind: output, shape index: {}]  }
   0x1   :  { %8 = vsyncpa [#allocation3], 0 }
   0x2   :  { %10 = vsyncpa [#allocation3 + $0x1], 0 }
   0x3   :  { %11 = vsyncpa [#allocation4], 0 }
   0x4   :  { %13 = vsyncpa [#allocation4 + $0x1], 0  ;;  %s495_s9 = smov 0   ;;  %s497_s10 = smov 0  }
   0x5   :  { %s499_s11 = smov 0   ;;  %s501_s12 = smov 0  }
   0x6 LB: > { %s516_s13 = sadd.s32 4294967295, %s474_s12   ;;  %s291_s14 = sadd.s32 4294967294, %s474_s12   ;;  %s474_s12 = sphi %s501_s12, %s663_s12   ;;  %s470_s11 = sphi %s499_s11, %s662_s11   ;;  %s466_s10 = sphi %s497_s10, %s661_s10   ;;  %s462_s9 = sphi %s495_s9, %s660_s9  }
   0x7   : > { %p60_p0 = scmp.ne.s32.totalorder %s466_s10, %s462_s9  ;;  %p644_p1 = scmp.eq.s32.totalorder %s516_s13, 0 }
   0x8   : > { %p84_p2 = scmp.eq.s32.totalorder %s516_s13, 1  ;;  %p90_p3 = scmp.eq.s32.totalorder %s291_s14, 1 }
   0x9   : > { %p525_p4 = por %p644_p1, %p60_p0  ;;  %p292_p5 = scmp.ge.s32.totalorder %s474_s12, 1 }
   0xa   : > { %p530_p6 = por %p90_p3, %p60_p0  ;;  %p97_p7 = scmp.lt.s32.totalorder %s474_s12, 3 }
   0xb   : > { %s648_s15 = scalar_select %p525_p4, 1, 0 }
   0xc   : > { %s649_s16 = scalar_select %p530_p6, 1, 0 }
   0xd   : > { %p535_p8 = pnand %p292_p5, %p97_p7  ;;  %s541_s18 = sadd.s32 1, %s474_s12  }
   0xe   : > { %s44_s19 = ssub.s32 %s474_s12, %s541_s18  ;;  %s47_s20 = sadd.s32 1, %s470_s11 }
   0xf   : > { %s650_s17 = scalar_select %p535_p8, 1, 0 }
  0x10   : > { %p317_p10 = pneg %p535_p8  ;;  %p45_p12 = scmp.eq.s32.totalorder %s44_s19, 0 }
  0x11   : > { %p54_p13 = scmp.ne.s32.totalorder %s470_s11, %s466_s10  ;;  %p55_p0 = scmp.eq.s32.totalorder %s474_s12, 0 }
  0x12   : > { %p318_p11 = pnand %p317_p10, %p644_p1  ;;  %p330_p3 = scmp.lt.s32.totalorder %s474_s12, 2 }
  0x13   : > { %s476_s21 = smov [#allocation2]   ;;  %p56_p5 = por %p55_p0, %p54_p13 }
  0x14   : > { %320 = dma.hbm_to_smem (!%p318_p11), %s641_s0, 16, %s476_s21, [#allocation5]  }
  0x15   : > { %s558_s24 = scalar_select %p45_p12, %s470_s11, %s47_s20  }
  0x16   : > { %p562_p7 = por %p84_p2, %p54_p13  ;;  %s119_s26 = sand.u32 1, %s470_s11  }
  0x17   : > { %s296_s27 = sshll.u32 %s474_s12, 7  ;;  %s295_s28 = sshll.u32 %s119_s26, 3 }
  0x18   : > { %s651_s25 = scalar_select %p562_p7, 1, 0 }
  0x19   : > { %s571_s3 = scalar_lea.hbm %s642_s1, %s296_s27  ;;  %s123_s4 = scalar_lea.vmem [#allocation6], %s295_s28 }
  0x1a   : > { %s130_s5 = sshll.u32 %s123_s4, 4  ;;  %p573_p10 = pnand %p330_p3, %p56_p5  ;;  %s131_s5 = int_to_ptr.vmem [resolvable:$true] %s130_s5 }
  0x1b   : > { %s120_s7 = scalar_lea.sflag [#allocation3], %s119_s26  ;;  %s378_s8 = scalar_lea.hbm %s571_s3, 128 }
  0x1c   : > { %p379_p2 = scmp.ne.s32.totalorder %s571_s3, %s378_s8  ;;  %p380_p11 = pneg %p573_p10 }
  0x1d   : > { %s383_s20 = scalar_lea.hbm %s642_s1, 256  ;;  %p384_p0 = scmp.lt.s32.totalorder %s571_s3, %s642_s1 }
  0x1e   : > { %p381_p12 = pnand %p380_p11, %p379_p2  ;;  %p385_p3 = scmp.lt.s32.totalorder %s383_s20, %s378_s8 }
  0x20   : > { %p382_p13 = pneg %p381_p12  ;;  %p386_p5 = por %p385_p3, %p384_p0 }
  0x22   : > { %p387_p9 = pnand %p386_p5, %p382_p13 }
  0x24   : > { %390 = shalt.err (!%p387_p9)
}
  0x25   : > { %s391_s23 = scalar_lea.vmem %s131_s5, 128  ;;  %s477_s26 = smov [#allocation6]  }
  0x26   : > { %p392_p1 = scmp.ne.s32.totalorder %s131_s5, %s391_s23  ;;  %s396_s27 = sshll.u32 %s477_s26, 4  ;;  %s397_s27 = int_to_ptr.vmem [resolvable:$false] %s396_s27 }
  0x27   : > { %s398_s28 = scalar_lea.vmem %s397_s27, 256  ;;  %p399_p2 = scmp.lt.s32.totalorder %s131_s5, %s397_s27 }
  0x28   : > { %p394_p6 = pnand %p392_p1, %p380_p11  ;;  %p400_p12 = scmp.lt.s32.totalorder %s398_s28, %s391_s23 }
  0x2a   : > { %p395_p7 = pneg %p394_p6  ;;  %p401_p4 = por %p400_p12, %p399_p2 }
  0x2c   : > { %p402_p8 = pnand %p401_p4, %p395_p7 }
  0x2e   : > { %405 = shalt.err (!%p402_p8)
}
  0x2f   : > { %324 = dma.hbm_to_vmem [thread:$0]  (!%p573_p10), %s571_s3, 128, %s131_s5, %s120_s7  }
  0x30   : > { %p653_p13 = scmp.ne.s32.totalorder %s650_s17, 0 }
  0x31   : > { %p654_p9 = scmp.eq.s32.totalorder (!%p653_p13), %s516_s13, 0 }
  0x32   : > { %139 = sbr.rel (%p653_p13) target bundleno = 201 (0xc9), region = 28 }
  0x37   : > { %449 = dma.done.wait (%p654_p9), [#allocation5], 16   ;;  %p655_p1 = pmov %p654_p9 }
  0x38   : > { %s598_s29 = sand.u32 1, %s466_s10   ;;  %p656_p4 = scmp.ne.s32.totalorder %s648_s15, 0 }
  0x39   : > { %451 = vsyncadd (%p655_p1), [#allocation5], 4294967280  ;;  %s299_s30 = sshll.u32 %s598_s29, 3  ;;  %s146_s4 = scalar_lea.sflag [#allocation3], %s598_s29 }
  0x3a   : > { %s149_s6 = scalar_lea.vmem [#allocation6], %s299_s30 }
  0x3b   : > { %453 = dma.done.wait (%p656_p4), %s146_s4, 128  }
  0x3c   : > { %455 = vsyncadd (%p656_p4), %s146_s4, 4294967168 }
  0x3d   : > { %154 = sfence }
  0x3e   : > { %v171_v0 = vld [vmem:[%s149_s6] sm:$0xff]  ;;  %s478_s17 = smov 127   ;;  %s176_s3 = sld [smem:[#allocation2]] }
  0x3f   : > { %172 = vrot.lane.b32.xlu0 %v171_v0, %s478_s17  ;;  %s302_s5 = sld [smem:[#allocation2 + $0x2]]  ;;  %v174_v2 = vrot.slane %v171_v0, 1  ;;  %s306_s15 = sshll.u32 %s516_s13, 7 }
  0x40   : > { %s301_s7 = sld [smem:[#allocation2 + $0x1]]  ;;  %s170_s19 = scalar_lea.vmem [#allocation7], %s299_s30 }
  0x41   : > { %s303_s8 = sld [smem:[#allocation2 + $0x3]]  ;;  %s209_s20 = sshll.u32 %s170_s19, 4  ;;  %s210_s20 = int_to_ptr.vmem [resolvable:$true] %s209_s20 }
  0x42   : > { %s304_s14 = sld [smem:[#allocation2 + $0x4]]  ;;  %s207_s23 = scalar_lea.hbm %s643_s2, %s306_s15 }
  0x43   : > { %s196_s26 = scalar_lea.sflag [#allocation4], %s598_s29  ;;  %s406_s27 = scalar_lea.vmem %s210_s20, 128 }
  0x44   : > { %v177_v1 = vstv %s176_s3  ;;  %p407_p6 = scmp.ne.s32.totalorder %s210_s20, %s406_s27  ;;  %p657_p8 = scmp.ne.s32.totalorder %s651_s25, 0 }
  0x45   : > { %v184_v3 = vstv %s302_s5  ;;  %v178_v5 = vmul.f32 %v177_v1, %v171_v0  ;;  %s479_s28 = smov [#allocation7]  }
  0x46   : > { %v180_v4 = vstv %s301_s7  ;;  %v185_v7 = vmul.f32 %v184_v3, %v174_v2  ;;  %p408_p7 = pnand %p407_p6, %p657_p8  ;;  %s410_s4 = sshll.u32 %s479_s28, 4  ;;  %s411_s4 = int_to_ptr.vmem [resolvable:$false] %s410_s4 }
  0x47   : > { %v188_v10 = vstv %s303_s8  ;;  %s412_s13 = scalar_lea.vmem %s411_s4, 256  ;;  %p413_p11 = scmp.lt.s32.totalorder %s210_s20, %s411_s4 }
  0x48   : > { %v192_v14 = vstv %s304_s14  ;;  %p409_p10 = pneg %p408_p7  ;;  %p414_p0 = scmp.lt.s32.totalorder %s412_s13, %s406_s27 }
  0x4a   : > { %p415_p3 = por %p414_p0, %p413_p11 }
  0x4c   : > { %p416_p5 = pnand %p415_p3, %p409_p10 }
  0xb1   : > { %v173_v6 = vpop.permute.xlu0 %172 }
  0xb2   : > { %v175_v8 = vrot.slane %v173_v6, 1  ;;  %v181_v9 = vmul.f32 %v180_v4, %v173_v6 }
  0xb4   : > { %v182_v11 = vadd.f32 %v181_v9, %v178_v5  ;;  %v189_v13 = vmul.f32 %v188_v10, %v175_v8 }
  0xb6   : > { %v186_v12 = vadd.f32 %v185_v7, %v182_v11 }
  0xb8   : > { %v190_v15 = vadd.f32 %v189_v13, %v186_v12 }
  0xba   : > { %v193_v16 = vadd.f32 %v192_v14, %v190_v15 }
  0xbc   : > { %194 = vst [vmem:[%s170_s19] sm:$0xff] %v193_v16 }
  0xbd   : > { %419 = shalt.err (!%p416_p5)
}
  0xbe   : > { %s420_s30 = scalar_lea.hbm %s207_s23, 128  ;;  %s424_s17 = scalar_lea.hbm %s643_s2, 256 }
  0xbf   : > { %p421_p2 = scmp.ne.s32.totalorder %s207_s23, %s420_s30  ;;  %p425_p9 = scmp.lt.s32.totalorder %s207_s23, %s643_s2 }
  0xc0   : > { %p426_p1 = scmp.lt.s32.totalorder %s424_s17, %s420_s30 }
  0xc1   : > { %p422_p12 = pnand %p421_p2, %p657_p8 }
  0xc2   : > { %p427_p4 = por %p426_p1, %p425_p9 }
  0xc3   : > { %p423_p13 = pneg %p422_p12 }
  0xc5   : > { %p428_p6 = pnand %p427_p4, %p423_p13 }
  0xc7   : > { %431 = shalt.err (!%p428_p6)
}
  0xc8   : > { %315 = dma.vmem_to_hbm [thread:$0]  (%p657_p8), %s210_s20, 128, %s207_s23, %s196_s26  }
  0xc9 PF: > { %s221_s7 = sand.u32 1, %s462_s9   ;;  %p658_p7 = scmp.ne.s32.totalorder %s649_s16, 0 }
  0xca   : > { %p659_p10 = scmp.ge.s32.totalorder %s474_s12, 2  ;;  %s222_s8 = scalar_lea.sflag [#allocation4], %s221_s7 }
  0xcc   : > { %p326_p11 = pnand %p659_p10, %p658_p7 }
  0xce   : > { %p327_p0 = pneg %p326_p11 }
  0xd0   : > { %457 = dma.done.wait (%p327_p0), %s222_s8, 128  }
  0xd1   : > { %459 = vsyncadd (%p327_p0), %s222_s8, 4294967168  ;;  %p16_p3 = scmp.ge.s32.totalorder %s541_s18, 4   ;;  %s660_s9 = smov %s466_s10 }
  0xd2   : > { %s661_s10 = smov %s470_s11  ;;  %s662_s11 = smov %s558_s24 }
  0xd3   : > { %s663_s12 = smov %s541_s18  ;;  %18 = sbr.rel (!%p16_p3) target bundleno = 6 (0x6), region = 78 }
  0xd8   :  { %227 = vsyncpa [#allocation3], 1 }
  0xd9   :  { %229 = vsyncpa [#allocation3 + $0x1], 1 }
  0xda   :  { %230 = vsyncpa [#allocation4], 1 }
  0xdb   :  { %232 = vsyncpa [#allocation4 + $0x1], 1 }
  0xdc   :  { %233 = vsyncpa [#allocation5], 1 }
  0xdd   :  { %235 = vsyncpa [#allocation5 + $0x1], 1 }

</bundles_post_ra>
